<compile_context>
chip_gen: v7x
topology: tpu7x:2x2x1
jax: 0.10.0
libtpu: 0.0.40
codegen_flags: <defaults>
</compile_context>

<pallas_src>
import functools

import jax
import jax.numpy as jnp
from jax.experimental import pallas as pl
from jax.experimental.pallas import tpu as pltpu


def _round_up(x, m):
    return ((x + m - 1) // m) * m


def _fused_ensemble_kernel(x_ref, w1_ref, b1_ref, w2_ref, b2_ref, w3_ref, b3_ref,
                           o_ref):
    # x_ref:  [TB, d_in_pad]       (obs | act | zero pad)
    # w1_ref: [d_in_pad, E*H]      b1_ref: [1, E*H]      (f32 bias)
    # w2_ref: [E*H, E*H]  (block-diag)      b2_ref: [1, E*H]
    # w3_ref: [E*H, N_pad] (block-diag, zero-padded cols) b3_ref: [1, N_pad]
    # o_ref:  [TB, N_pad]          (lane-dense, unmasked stores)
    wdt = w1_ref.dtype
    x = x_ref[...].astype(wdt)
    h1 = jnp.tanh(
        jnp.dot(x, w1_ref[...], preferred_element_type=jnp.float32) + b1_ref[...]
    )
    h2 = jnp.tanh(
        jnp.dot(h1.astype(wdt), w2_ref[...], preferred_element_type=jnp.float32)
        + b2_ref[...]
    )
    y = (
        jnp.dot(h2.astype(wdt), w3_ref[...], preferred_element_type=jnp.float32)
        + b3_ref[...]
    )
    o_ref[...] = y.astype(o_ref.dtype)


def pack_fused_params(params, obs_dim, compute_dtype=jnp.float32):
    """One-time packing of per-member weights into the fused/padded layout.

    params: dict of stacked ensemble weights (see init_ensemble_params), with
            wK of shape [E, in, out] and bK of shape [E, out].
    compute_dtype: dtype for weights / MXU inputs (jnp.bfloat16 recommended on
                   v6e/v7x; keep jnp.float32 on v5e). Biases / accum stay f32.
    """
    del obs_dim  # concat is now done wrapper-side on a single padded slab
    w1, b1 = params["w1"], params["b1"]   # [E, d_in, H], [E, H]
    w2, b2 = params["w2"], params["b2"]   # [E, H, H],    [E, H]
    w3, b3 = params["w3"], params["b3"]   # [E, H, d_out],[E, d_out]
    E, d_in, H = w1.shape
    d_out = w3.shape[-1]
    EH = E * H
    d_in_pad = _round_up(d_in, 8)          # 15 -> 16 (zero row absorbs input pad col)
    n_out = E * d_out
    n_out_pad = _round_up(n_out, 128)      # 65 -> 128 (lane-dense output)

    # Shared-input layer: fold ensemble into the lane dim, pad contraction rows.
    w1_flat = jnp.transpose(w1, (1, 0, 2)).reshape(d_in, EH)
    w1_flat = jnp.pad(w1_flat, ((0, d_in_pad - d_in), (0, 0)))

    # Block-diagonal hidden/output layers (zero-fill done once here).
    eye = jnp.eye(E, dtype=w1.dtype)
    w2_bd = jnp.einsum("ef,eij->eifj", eye, w2).reshape(EH, EH)
    w3_bd = jnp.einsum("ef,eij->eifj", eye, w3).reshape(EH, n_out)
    w3_bd = jnp.pad(w3_bd, ((0, 0), (0, n_out_pad - n_out)))
    b3_pad = jnp.pad(b3.reshape(1, n_out), ((0, 0), (0, n_out_pad - n_out)))

    return {
        "w1": w1_flat.astype(compute_dtype),
        "b1": b1.reshape(1, EH).astype(jnp.float32),
        "w2": w2_bd.astype(compute_dtype),
        "b2": b2.reshape(1, EH).astype(jnp.float32),
        "w3": w3_bd.astype(compute_dtype),
        "b3": b3_pad.astype(jnp.float32),
        # Static metadata (Python ints; keep this dict out of traced args).
        "n_models": E,
        "d_out": d_out,
        "d_in": d_in,
        "d_in_pad": d_in_pad,
        "eh": EH,
        "n_out_pad": n_out_pad,
    }


def ensemble_force_forward(obs, action, fused, *, block_b=512):
    """Pallas implementation of EnsembleForceModel.forward.

    obs:    [B, obs_dim] float32
    action: [B, act_dim] float32
    fused:  packed params from pack_fused_params
    returns [n_models, B, obs_dim] float32
    """
    obs = obs.astype(jnp.float32)
    action = action.astype(jnp.float32)
    B = obs.shape[0]
    E = fused["n_models"]
    d_out = fused["d_out"]
    d_in = fused["d_in"]
    d_in_pad = fused["d_in_pad"]
    EH = fused["eh"]
    n_out_pad = fused["n_out_pad"]

    # Single lane-dense input slab: obs | act | zero pad  -> [B, d_in_pad].
    parts = [obs, action]
    if d_in_pad > d_in:
        parts.append(jnp.zeros((B, d_in_pad - d_in), jnp.float32))
    x = jnp.concatenate(parts, axis=-1)

    # Batch tile: multiple of 8 sublanes, capped so the double-buffered
    # (x + out) tiles stay tiny even against v7x's 64 MiB VMEM.
    tb = min(block_b, _round_up(B, 8))
    tb = _round_up(tb, 8)
    b_pad = _round_up(B, tb)
    if b_pad != B:
        x = jnp.pad(x, ((0, b_pad - B), (0, 0)))
    grid = (b_pad // tb,)

    # Advisory cost estimate (flops / transcendentals / bytes).
    flops = 2 * b_pad * (d_in_pad * EH + EH * EH + EH * n_out_pad)
    transcendentals = 2 * b_pad * EH
    weight_bytes = sum(
        int(fused[k].size) * jnp.dtype(fused[k].dtype).itemsize
        for k in ("w1", "b1", "w2", "b2", "w3", "b3")
    )
    bytes_accessed = int(x.size) * 4 + weight_bytes + b_pad * n_out_pad * 4

    y_flat = pl.pallas_call(
        _fused_ensemble_kernel,
        out_shape=jax.ShapeDtypeStruct((b_pad, n_out_pad), jnp.float32),
        grid_spec=pltpu.PrefetchScalarGridSpec(
            num_scalar_prefetch=0,
            grid=grid,
            in_specs=[
                pl.BlockSpec((tb, d_in_pad), lambda i: (i, 0)),      # streaming input
                pl.BlockSpec((d_in_pad, EH), lambda i: (0, 0)),       # VMEM-resident
                pl.BlockSpec((1, EH), lambda i: (0, 0)),
                pl.BlockSpec((EH, EH), lambda i: (0, 0)),
                pl.BlockSpec((1, EH), lambda i: (0, 0)),
                pl.BlockSpec((EH, n_out_pad), lambda i: (0, 0)),
                pl.BlockSpec((1, n_out_pad), lambda i: (0, 0)),
            ],
            out_specs=pl.BlockSpec((tb, n_out_pad), lambda i: (i, 0)),  # streaming out
        ),
        compiler_params=pltpu.CompilerParams(
            dimension_semantics=("parallel",),          # v7x: split batch over 2 TCs
            vmem_limit_bytes=32 * 1024 * 1024,          # explicit, safe on v5e/v6e/v7x
        ),
        cost_estimate=pl.CostEstimate(
            flops=flops,
            transcendentals=transcendentals,
            bytes_accessed=bytes_accessed,
        ),
    )(x, fused["w1"], fused["b1"], fused["w2"], fused["b2"], fused["w3"], fused["b3"])

    # Slice off batch padding and the zero-padded output lanes, then
    # [B, E*d_out] -> [E, B, d_out] to match torch.stack([...], dim=0).
    # (Keep this under the same jit as the consumer so XLA fuses the fixup.)
    y = y_flat[:B, : E * d_out]
    return jnp.transpose(y.reshape(B, E, d_out), (1, 0, 2))


def init_ensemble_params(key, n_models, obs_dim, act_dim, hidden):
    """Deterministic synthetic init mirroring nn.Linear's uniform(-1/sqrt(fan_in), ...).

    Weights are stored as [n_models, in_features, out_features] (transposed vs PyTorch).
    """
    d_in = obs_dim + act_dim
    d_out = obs_dim
    sizes = [(d_in, hidden), (hidden, hidden), (hidden, d_out)]
    params = {}
    for i, (fi, fo) in enumerate(sizes, start=1):
        key, kw, kb = jax.random.split(key, 3)
        bound = 1.0 / jnp.sqrt(jnp.float32(fi))
        params[f"w{i}"] = jax.random.uniform(
            kw, (n_models, fi, fo), jnp.float32, -bound, bound
        )
        params[f"b{i}"] = jax.random.uniform(
            kb, (n_models, fo), jnp.float32, -bound, bound
        )
    return params


def _reference_forward(obs, action, params):
    """Pure-JAX reference of the ensemble MLP forward for validation."""
    inp = jnp.concatenate([obs, action], axis=-1)
    h1 = jnp.tanh(jnp.einsum("bi,eio->ebo", inp, params["w1"]) + params["b1"][:, None, :])
    h2 = jnp.tanh(jnp.einsum("ebi,eio->ebo", h1, params["w2"]) + params["b2"][:, None, :])
    return jnp.einsum("ebi,eio->ebo", h2, params["w3"]) + params["b3"][:, None, :]


if __name__ == "__main__":
    # Small shapes consistent with the module:
    #   obs_dim = 13 (pybullet state unpacked in get_model_predictions),
    #   act_dim = 2 (throttle, steer), hiddens = [32, 32], n_models = 5.
    B = 16
    OBS_DIM = 13
    ACT_DIM = 2
    HIDDEN = 32
    N_MODELS = 5

    key = jax.random.PRNGKey(0)
    k_obs, k_act, k_par = jax.random.split(key, 3)
    obs = jax.random.normal(k_obs, (B, OBS_DIM), jnp.float32)
    action = jax.random.normal(k_act, (B, ACT_DIM), jnp.float32)
    params = init_ensemble_params(k_par, N_MODELS, OBS_DIM, ACT_DIM, HIDDEN)

    # f32 here for exact reference matching; use compute_dtype=jnp.bfloat16 on v6e/v7x.
    fused = pack_fused_params(params, OBS_DIM, compute_dtype=jnp.float32)

    # block_b=8 so the demo exercises a multi-step batch grid with VMEM-resident weights.
    fwd = jax.jit(
        functools.partial(ensemble_force_forward, fused=fused, block_b=8)
    )
    out = jax.block_until_ready(fwd(obs, action))

    ref = _reference_forward(obs, action, params)
    assert out.shape == (N_MODELS, B, OBS_DIM), out.shape
    assert jnp.allclose(out, ref, atol=1e-5, rtol=1e-5), "mismatch vs reference"

    # TODO(synk): predict()/get_model_predictions() depend on an external
    # `kinematics.forward_dynamics` model and a normalizer; only forward() is kernelized.
    print("KERNEL_OK")
</pallas_src>

<mosaic_0001>
module attributes {stable_mosaic.version = 11 : i64} {
  func.func @_fused_ensemble_kernel(%arg0: i32, %arg1: memref<8x16xf32, #tpu.memory_space<vmem>>, %arg2: memref<16x160xf32, #tpu.memory_space<vmem>>, %arg3: memref<1x160xf32, #tpu.memory_space<vmem>>, %arg4: memref<160x160xf32, #tpu.memory_space<vmem>>, %arg5: memref<1x160xf32, #tpu.memory_space<vmem>>, %arg6: memref<160x128xf32, #tpu.memory_space<vmem>>, %arg7: memref<1x128xf32, #tpu.memory_space<vmem>>, %arg8: memref<8x128xf32, #tpu.memory_space<vmem>>) attributes {dimension_semantics = [#tpu.dimension_semantics<parallel>], iteration_bounds = array<i64: 2>, scalar_prefetch = 0 : i64, scratch_operands = 0 : i64, tpu.core_type = #tpu.core_type<tc>, window_params = [{transform_indices = @transform_0, window_bounds = array<i64: 8, 16>}, {pipeline_mode = #tpu.pipeline_mode<synchronous>, transform_indices = @transform_1, window_bounds = array<i64: 16, 160>}, {pipeline_mode = #tpu.pipeline_mode<synchronous>, transform_indices = @transform_2, window_bounds = array<i64: 1, 160>}, {pipeline_mode = #tpu.pipeline_mode<synchronous>, transform_indices = @transform_3, window_bounds = array<i64: 160, 160>}, {pipeline_mode = #tpu.pipeline_mode<synchronous>, transform_indices = @transform_4, window_bounds = array<i64: 1, 160>}, {pipeline_mode = #tpu.pipeline_mode<synchronous>, transform_indices = @transform_5, window_bounds = array<i64: 160, 128>}, {pipeline_mode = #tpu.pipeline_mode<synchronous>, transform_indices = @transform_6, window_bounds = array<i64: 1, 128>}, {transform_indices = @transform_7, window_bounds = array<i64: 8, 128>}]} {
    %c0 = arith.constant 0 : index
    %c0_0 = arith.constant 0 : index
    %0 = vector.load %arg1[%c0, %c0_0] : memref<8x16xf32, #tpu.memory_space<vmem>>, vector<8x16xf32>
    %c0_1 = arith.constant 0 : index
    %c0_2 = arith.constant 0 : index
    %1 = vector.load %arg2[%c0_1, %c0_2] : memref<16x160xf32, #tpu.memory_space<vmem>>, vector<16x160xf32>
    %cst = arith.constant dense<0.000000e+00> : vector<8x160xf32>
    %2 = tpu.matmul %0, %1, %cst {dimension_numbers = #tpu.dot_dimension_numbers<[1], [0], [0], [1], [0, 0, 1, 1], [], []>} : vector<8x16xf32>, vector<16x160xf32>, vector<8x160xf32> -> vector<8x160xf32>
    %c0_3 = arith.constant 0 : index
    %c0_4 = arith.constant 0 : index
    %3 = vector.load %arg3[%c0_3, %c0_4] : memref<1x160xf32, #tpu.memory_space<vmem>>, vector<1x160xf32>
    %4 = vector.broadcast %3 : vector<1x160xf32> to vector<8x160xf32>
    %5 = arith.addf %2, %4 : vector<8x160xf32>
    %6 = math.tanh %5 : vector<8x160xf32>
    %c0_5 = arith.constant 0 : index
    %c0_6 = arith.constant 0 : index
    %7 = vector.load %arg4[%c0_5, %c0_6] : memref<160x160xf32, #tpu.memory_space<vmem>>, vector<160x160xf32>
    %cst_7 = arith.constant dense<0.000000e+00> : vector<8x160xf32>
    %8 = tpu.matmul %6, %7, %cst_7 {dimension_numbers = #tpu.dot_dimension_numbers<[1], [0], [0], [1], [0, 0, 1, 1], [], []>} : vector<8x160xf32>, vector<160x160xf32>, vector<8x160xf32> -> vector<8x160xf32>
    %c0_8 = arith.constant 0 : index
    %c0_9 = arith.constant 0 : index
    %9 = vector.load %arg5[%c0_8, %c0_9] : memref<1x160xf32, #tpu.memory_space<vmem>>, vector<1x160xf32>
    %10 = vector.broadcast %9 : vector<1x160xf32> to vector<8x160xf32>
    %11 = arith.addf %8, %10 : vector<8x160xf32>
    %12 = math.tanh %11 : vector<8x160xf32>
    %c0_10 = arith.constant 0 : index
    %c0_11 = arith.constant 0 : index
    %13 = vector.load %arg6[%c0_10, %c0_11] : memref<160x128xf32, #tpu.memory_space<vmem>>, vector<160x128xf32>
    %cst_12 = arith.constant dense<0.000000e+00> : vector<8x128xf32>
    %14 = tpu.matmul %12, %13, %cst_12 {dimension_numbers = #tpu.dot_dimension_numbers<[1], [0], [0], [1], [0, 0, 1, 1], [], []>} : vector<8x160xf32>, vector<160x128xf32>, vector<8x128xf32> -> vector<8x128xf32>
    %c0_13 = arith.constant 0 : index
    %c0_14 = arith.constant 0 : index
    %15 = vector.load %arg7[%c0_13, %c0_14] : memref<1x128xf32, #tpu.memory_space<vmem>>, vector<1x128xf32>
    %16 = vector.broadcast %15 : vector<1x128xf32> to vector<8x128xf32>
    %17 = arith.addf %14, %16 : vector<8x128xf32>
    %c0_15 = arith.constant 0 : index
    %c0_16 = arith.constant 0 : index
    %18 = vector.load %arg8[%c0_15, %c0_16] : memref<8x128xf32, #tpu.memory_space<vmem>>, vector<8x128xf32>
    tpu.vector_store %arg8[%c0_15, %c0_16], %17 {strides = array<i32>} : memref<8x128xf32, #tpu.memory_space<vmem>>, vector<8x128xf32>,
    return
  }
  func.func @transform_0(%arg0: i32) -> (i32, i32) {
    %c0_i32 = arith.constant 0 : i32
    %c0_i32_0 = arith.constant 0 : i32
    return %arg0, %c0_i32 : i32, i32
  }
  func.func @transform_1(%arg0: i32) -> (i32, i32) {
    %c0_i32 = arith.constant 0 : i32
    %c0_i32_0 = arith.constant 0 : i32
    %c0_i32_1 = arith.constant 0 : i32
    return %c0_i32, %c0_i32_0 : i32, i32
  }
  func.func @transform_2(%arg0: i32) -> (i32, i32) {
    %c0_i32 = arith.constant 0 : i32
    %c0_i32_0 = arith.constant 0 : i32
    %c0_i32_1 = arith.constant 0 : i32
    return %c0_i32, %c0_i32_0 : i32, i32
  }
  func.func @transform_3(%arg0: i32) -> (i32, i32) {
    %c0_i32 = arith.constant 0 : i32
    %c0_i32_0 = arith.constant 0 : i32
    %c0_i32_1 = arith.constant 0 : i32
    return %c0_i32, %c0_i32_0 : i32, i32
  }
  func.func @transform_4(%arg0: i32) -> (i32, i32) {
    %c0_i32 = arith.constant 0 : i32
    %c0_i32_0 = arith.constant 0 : i32
    %c0_i32_1 = arith.constant 0 : i32
    return %c0_i32, %c0_i32_0 : i32, i32
  }
  func.func @transform_5(%arg0: i32) -> (i32, i32) {
    %c0_i32 = arith.constant 0 : i32
    %c0_i32_0 = arith.constant 0 : i32
    %c0_i32_1 = arith.constant 0 : i32
    return %c0_i32, %c0_i32_0 : i32, i32
  }
  func.func @transform_6(%arg0: i32) -> (i32, i32) {
    %c0_i32 = arith.constant 0 : i32
    %c0_i32_0 = arith.constant 0 : i32
    %c0_i32_1 = arith.constant 0 : i32
    return %c0_i32, %c0_i32_0 : i32, i32
  }
  func.func @transform_7(%arg0: i32) -> (i32, i32) {
    %c0_i32 = arith.constant 0 : i32
    %c0_i32_0 = arith.constant 0 : i32
    return %arg0, %c0_i32 : i32, i32
  }
}

</mosaic_0001>

<bundles_post_ra>
// kernel: ensemble_force_forward.1
= control target key start
LH: loop header
LB: loop body
LE: loop exit
PB: predicated region body
PF: predicated region fallthrough
CT: control target
= control target key end

     0   :  { %12 = vsyncpa [#allocation3], 0  ;;  %s1090_s0 = inlined_call_operand.vmem [shape: f32[16,16], index: 0, kind: input, shape index: {}]   ;;  %s1091_s1 = inlined_call_operand.vmem [shape: f32[16,160], index: 1, kind: input, shape index: {}]   ;;  %s1092_s2 = inlined_call_operand.vmem [shape: f32[1,160], index: 2, kind: input, shape index: {}]   ;;  %s1093_s3 = inlined_call_operand.hbm [shape: f32[160,160], index: 3, kind: input, shape index: {}]   ;;  %s1094_s4 = inlined_call_operand.vmem [shape: f32[1,160], index: 4, kind: input, shape index: {}]   ;;  %s1095_s5 = inlined_call_operand.hbm [shape: f32[160,128], index: 5, kind: input, shape index: {}]   ;;  %s1096_s6 = inlined_call_operand.vmem [shape: f32[1,128], index: 6, kind: input, shape index: {}]   ;;  %s1097_s7 = inlined_call_operand.vmem [shape: f32[16,128], index: 7, kind: output, shape index: {}]  }
   0x1   :  { %13 = vsyncpa [#allocation5], 0  ;;  %s957_s24 = smov 0  }
   0x2 LB: > { %s909_s25 = smov [#allocation2]   ;;  %s963_s27 = sadd.s32 4294967295, %s907_s24   ;;  %s907_s24 = sphi %s957_s24, %s19_s24  }
   0x3   : > { %s220_s26 = sshll.u32 %s909_s25, 4  ;;  %p705_p0 = scmp.ge.s32.totalorder %s907_s24, 1  ;;  %s221_s26 = int_to_ptr.vmem [resolvable:$true] %s220_s26 }
   0x4   : > { %p202_p1 = scmp.lt.s32.totalorder %s907_s24, 3  ;;  %p1098_p3 = scmp.eq.s32.totalorder %s963_s27, 0 }
   0x5   : > { %s910_s29 = smov [#allocation4]   ;;  %s837_s11 = scalar_lea.hbm %s1093_s3, 5120 }
   0x6   : > { %p967_p2 = pnand %p705_p0, %p202_p1  ;;  %s236_s30 = sshll.u32 %s910_s29, 4  ;;  %s980_s30 = int_to_ptr.vmem [resolvable:$true] %s236_s30 }
   0x7   : > { %p838_p6 = scmp.ne.s32.totalorder %s1093_s3, %s837_s11  ;;  %p844_p10 = scmp.lt.u32.totalorder %s837_s11, %s1093_s3 }
   0x8   : > { %s1100_s28 = scalar_select %p967_p2, 1, 0 }
   0x9   : > { %p802_p4 = pneg %p967_p2 }
   0xb   : > { %p976_p5 = pnand %p1098_p3, %p802_p4 }
   0xd   : > { %p839_p7 = pneg %p976_p5 }
   0xf   : > { %p840_p8 = pnand %p839_p7, %p838_p6 }
  0x11   : > { %p841_p9 = pneg %p840_p8 }
  0x13   : > { %p846_p11 = pnand %p844_p10, %p841_p9 }
  0x15   : > { %849 = shalt.err (!%p846_p11)
}
  0x16   : > { %s850_s16 = scalar_lea.vmem %s221_s26, 5120  ;;  %p858_p1 = scmp.lt.s32.totalorder %s221_s26, %s221_s26 }
  0x17   : > { %p851_p12 = scmp.ne.s32.totalorder %s221_s26, %s850_s16  ;;  %p859_p4 = scmp.lt.s32.totalorder %s850_s16, %s850_s16 }
  0x19   : > { %p853_p13 = pnand %p851_p12, %p839_p7  ;;  %p860_p3 = por %p859_p4, %p858_p1 }
  0x1b   : > { %p854_p0 = pneg %p853_p13 }
  0x1d   : > { %p861_p2 = pnand %p860_p3, %p854_p0 }
  0x1f   : > { %864 = shalt.err (!%p861_p2)
}
  0x20   : > { %s911_s17 = smov 256   ;;  %s912_s18 = smov 16  }
  0x21   : > { %805 = dma.hbm_to_vmem [thread:$0]  (!%p976_p5), %s1093_s3, 5120, %s221_s26, [#allocation3], %s911_s17, %s911_s17, %s912_s18  }
  0x22   : > { %s865_s23 = scalar_lea.hbm %s1095_s5, 2560 }
  0x23   : > { %p866_p6 = scmp.ne.s32.totalorder %s1095_s5, %s865_s23  ;;  %p872_p8 = scmp.lt.u32.totalorder %s865_s23, %s1095_s5 }
  0x25   : > { %p868_p2 = pnand %p866_p6, %p839_p7 }
  0x27   : > { %p869_p3 = pneg %p868_p2 }
  0x29   : > { %p874_p9 = pnand %p872_p8, %p869_p3 }
  0x2b   : > { %877 = shalt.err (!%p874_p9)
}
  0x2c   : > { %s878_s26 = scalar_lea.vmem %s980_s30, 2560  ;;  %p886_p13 = scmp.lt.s32.totalorder %s980_s30, %s980_s30 }
  0x2d   : > { %p879_p10 = scmp.ne.s32.totalorder %s980_s30, %s878_s26  ;;  %p887_p0 = scmp.lt.s32.totalorder %s878_s26, %s878_s26 }
  0x2f   : > { %p881_p11 = pnand %p879_p10, %p839_p7  ;;  %p888_p1 = por %p887_p0, %p886_p13 }
  0x31   : > { %p882_p12 = pneg %p881_p11 }
  0x33   : > { %p889_p4 = pnand %p888_p1, %p882_p12 }
  0x35   : > { %892 = shalt.err (!%p889_p4)
}
  0x36   : > { %s913_s11 = smov 128   ;;  %s914_s12 = smov 8  }
  0x37   : > { %808 = dma.hbm_to_vmem [thread:$0]  (!%p976_p5), %s1095_s5, 2560, %s980_s30, [#allocation5], %s913_s11, %s913_s11, %s914_s12  }
  0x38   : > { %p1102_p6 = scmp.ne.s32.totalorder %s1100_s28, 0 }
  0x39   : > { %p1103_p7 = scmp.eq.s32.totalorder (!%p1102_p6), %s963_s27, 0 }
  0x3a   : > { %262 = sbr.rel (%p1102_p6) target bundleno = 746 (0x2ea), region = 48 }
  0x41   : > { %898 = dma.done.wait (%p1103_p7), [#allocation3], 5120   ;;  %p1104_p2 = pmov %p1103_p7 }
  0x43   : > { %900 = vsyncadd (%p1104_p2), [#allocation3], 4294962176  ;;  %p1105_p3 = pmov %p1104_p2 }
  0x44   : > { %p1106_p8 = pmov %p1104_p2 }
  0x45   : > { %902 = dma.done.wait (%p1105_p3), [#allocation5], 2560  }
  0x46   : > { %904 = vsyncadd (%p1106_p8), [#allocation5], 4294964736  ;;  %p296_p9 = scmp.lt.s32.totalorder %s963_s27, 1  ;;  %v915_v0 = vmov 0.0   ;;  %v306_v1 = vld [vmem:[%s1091_s1 + $0x8] sm:$0xff]  ;;  %v308_v2 = vld [vmem:[%s1091_s1 + $0x18] sm:$0xff] }
  0x47   : > { %389 = vmatprep.mubr.f32.mxu0 %v915_v0  ;;  %v305_v3 = vld [vmem:[%s1091_s1] sm:$0xff]  ;;  %v720_v4 = vpack.c.bf16 %v308_v2, %v306_v1  ;;  %v307_v5 = vld [vmem:[%s1091_s1 + $0x10] sm:$0xff]  ;;  %v399_v6 = vld [vmem:[#allocation2 + $0x8] sm:$0xff]  ;;  %vm321_vm0 = vcmask 130048   ;;  %vm450_vm1 = vcmask 261120  }
  0x48   : > { %s1108_s27 = smov (!%p296_p9, %s963_s27), 1  ;;  %v722_v7 = vpack.c.bf16 %v307_v5, %v305_v3  ;;  %v401_v9 = vld [vmem:[#allocation2 + $0x18] sm:$0xff]  ;;  %v398_v10 = vld [vmem:[#allocation2] sm:$0xff]  ;;  %v400_v11 = vld [vmem:[#allocation2 + $0x10] sm:$0xff] }
  0x49   : > { %s712_s28 = sshll.u32 %s1108_s27, 3  ;;  %721 = vmatprep.subr.bf16.mxu0 %v720_v4  ;;  %v724_v12 = vpack.c.bf16 %v401_v9, %v399_v6  ;;  %v726_v13 = vpack.c.bf16 %v400_v11, %v398_v10  ;;  %v403_v14 = vld [vmem:[#allocation2 + $0x28] sm:$0xff]  ;;  %v405_v15 = vld [vmem:[#allocation2 + $0x38] sm:$0xff]  ;;  %v402_v16 = vld [vmem:[#allocation2 + $0x20] sm:$0xff] }
  0x4a   : > { %s299_s15 = scalar_lea.vmem %s1090_s0, %s712_s28  ;;  %723 = vmatpush1.bf16.msra.mxu0 %v722_v7  ;;  %v728_v17 = vpack.c.bf16 %v405_v15, %v403_v14  ;;  %v404_v18 = vld [vmem:[#allocation2 + $0x30] sm:$0xff]  ;;  %v407_v19 = vld [vmem:[#allocation2 + $0x48] sm:$0xff]  ;;  %v409_v20 = vld [vmem:[#allocation2 + $0x58] sm:$0xff]  ;;  %v916_v7 = vmov 0.0|0.0   ;;  %s303_s14 = scalar_lea.vmem %s1097_s7, %s712_s28 }
  0x4b   : > { %v304_v8 = vld [vmem:[%s299_s15] sm:$0xff]  ;;  %725 = vmatprep.subr.bf16.mxu1 %v724_v12  ;;  %v730_v21 = vpack.c.bf16 %v404_v18, %v402_v16  ;;  %v732_v22 = vpack.c.bf16 %v409_v20, %v407_v19  ;;  %v408_v24 = vld [vmem:[#allocation2 + $0x50] sm:$0xff]  ;;  %v411_v25 = vld [vmem:[#allocation2 + $0x68] sm:$0xff]  ;;  %764 = vmatprep.subr.bf16.mxu0 %v916_v7 }
  0x4c   : > { %727 = vmatpush1.bf16.msra.mxu1 %v726_v13  ;;  %v406_v23 = vld [vmem:[#allocation2 + $0x40] sm:$0xff]  ;;  %v413_v26 = vld [vmem:[#allocation2 + $0x78] sm:$0xff]  ;;  %v412_v30 = vld [vmem:[#allocation2 + $0x70] sm:$0xff] }
  0x4d   : > { %714 = vmatmul.mubr.msk.f32.vlgmr.msra.gmra.mrb[0].mxu0 %vm321_vm0, %v304_v8  ;;  %729 = vmatprep.subr.bf16.mxu1 %v728_v17  ;;  %v734_v27 = vpack.c.bf16 %v408_v24, %v406_v23  ;;  %v736_v28 = vpack.c.bf16 %v413_v26, %v411_v25  ;;  %v410_v29 = vld [vmem:[#allocation2 + $0x60] sm:$0xff]  ;;  %v415_v31 = vld [vmem:[#allocation2 + $0x88] sm:$0xff]  ;;  %v417_v32 = vld [vmem:[#allocation2 + $0x98] sm:$0xff]  ;;  %v311_v23 = vlaneseq }
  0x4e   : > { %v738_v33 = vpack.c.bf16 %v412_v30, %v410_v29  ;;  %v740_v34 = vpack.c.bf16 %v417_v32, %v415_v31  ;;  %v414_v35 = vld [vmem:[#allocation2 + $0x80] sm:$0xff]  ;;  %v416_v36 = vld [vmem:[#allocation2 + $0x90] sm:$0xff]  ;;  %v419_v37 = vld [vmem:[#allocation2 + $0xa8] sm:$0xff] }
  0x4f   : > { %v421_v38 = vld [vmem:[#allocation2 + $0xb8] sm:$0xff]  ;;  %v742_v39 = vpack.c.bf16 %v416_v36, %v414_v35  ;;  %v418_v41 = vld [vmem:[#allocation2 + $0xa0] sm:$0xff]  ;;  %v420_v42 = vld [vmem:[#allocation2 + $0xb0] sm:$0xff]  ;;  %v312_v24 = vshrl.u32 %v311_v23, 7 }
  0x50   : > { %731 = vmatpush1.bf16.msra.mxu1 %v730_v21  ;;  %v744_v40 = vpack.c.bf16 %v421_v38, %v419_v37  ;;  %v746_v43 = vpack.c.bf16 %v420_v42, %v418_v41  ;;  %v423_v44 = vld [vmem:[#allocation2 + $0xc8] sm:$0xff]  ;;  %v425_v45 = vld [vmem:[#allocation2 + $0xd8] sm:$0xff]  ;;  %v422_v47 = vld [vmem:[#allocation2 + $0xc0] sm:$0xff] }
  0x51   : > { %733 = vmatprep.subr.bf16.mxu1 %v732_v22  ;;  %v748_v46 = vpack.c.bf16 %v425_v45, %v423_v44  ;;  %v424_v48 = vld [vmem:[#allocation2 + $0xd0] sm:$0xff]  ;;  %v427_v50 = vld [vmem:[#allocation2 + $0xe8] sm:$0xff]  ;;  %v429_v51 = vld [vmem:[#allocation2 + $0xf8] sm:$0xff]  ;;  %v313_v25 = vsub.s32 0, %v312_v24 }
  0x52   : > { %v750_v49 = vpack.c.bf16 %v424_v48, %v422_v47  ;;  %v752_v52 = vpack.c.bf16 %v429_v51, %v427_v50  ;;  %v426_v53 = vld [vmem:[#allocation2 + $0xe0] sm:$0xff]  ;;  %v428_v54 = vld [vmem:[#allocation2 + $0xf0] sm:$0xff]  ;;  %v431_v56 = vld [vmem:[#allocation2 + $0x108] sm:$0xff] }
  0x53   : > { %v754_v55 = vpack.c.bf16 %v428_v54, %v426_v53  ;;  %v433_v57 = vld [vmem:[#allocation2 + $0x118] sm:$0xff]  ;;  %v430_v58 = vld [vmem:[#allocation2 + $0x100] sm:$0xff]  ;;  %v432_v60 = vld [vmem:[#allocation2 + $0x110] sm:$0xff] }
  0x54   : > { %735 = vmatpush1.bf16.msra.mxu1 %v734_v27  ;;  %v756_v59 = vpack.c.bf16 %v433_v57, %v431_v56  ;;  %v435_v61 = vld [vmem:[#allocation2 + $0x128] sm:$0xff]  ;;  %v437_v62 = vld [vmem:[#allocation2 + $0x138] sm:$0xff]  ;;  %v758_v63 = vpack.c.bf16 %v432_v60, %v430_v58  ;;  %v434_v1 = vld [vmem:[#allocation2 + $0x120] sm:$0xff]  ;;  %v317_v27 = vsub.s32 1, %v312_v24 }
  0x55   : > { %737 = vmatprep.subr.bf16.mxu1 %v736_v28  ;;  %v760_v0 = vpack.c.bf16 %v437_v62, %v435_v61  ;;  %v436_v2 = vld [vmem:[#allocation2 + $0x130] sm:$0xff]  ;;  %v527_v4 = vld [vmem:[#allocation4] sm:$0xff]  ;;  %v528_v5 = vld [vmem:[#allocation4 + $0x8] sm:$0xff] }
  0x56   : > { %v762_v3 = vpack.c.bf16 %v436_v2, %v434_v1  ;;  %v529_v6 = vld [vmem:[#allocation4 + $0x10] sm:$0xff]  ;;  %v765_v8 = vpack.c.bf16 %v528_v5, %v527_v4  ;;  %v530_v9 = vld [vmem:[#allocation4 + $0x18] sm:$0xff]  ;;  %v531_v11 = vld [vmem:[#allocation4 + $0x20] sm:$0xff] }
  0x57   : > { %v768_v10 = vpack.c.bf16 %v530_v9, %v529_v6  ;;  %v532_v12 = vld [vmem:[#allocation4 + $0x28] sm:$0xff]  ;;  %v533_v14 = vld [vmem:[#allocation4 + $0x30] sm:$0xff]  ;;  %v534_v15 = vld [vmem:[#allocation4 + $0x38] sm:$0xff] }
  0x58   : > { %739 = vmatpush1.bf16.msra.mxu1 %v738_v33  ;;  %766 = vmatpush1.bf16.msra.mxu0 %v765_v8  ;;  %v771_v13 = vpack.c.bf16 %v532_v12, %v531_v11  ;;  %v774_v16 = vpack.c.bf16 %v534_v15, %v533_v14  ;;  %v535_v17 = vld [vmem:[#allocation4 + $0x40] sm:$0xff]  ;;  %v536_v18 = vld [vmem:[#allocation4 + $0x48] sm:$0xff]  ;;  %v537_v20 = vld [vmem:[#allocation4 + $0x50] sm:$0xff] }
  0x59   : > { %741 = vmatprep.subr.bf16.mxu1 %v740_v34  ;;  %767 = vmatprep.subr.bf16.mxu0 %v916_v7  ;;  %v777_v19 = vpack.c.bf16 %v536_v18, %v535_v17  ;;  %v538_v21 = vld [vmem:[#allocation4 + $0x58] sm:$0xff]  ;;  %v309_v26 = vld [vmem:[%s1092_s2] sm:$0x3]  ;;  %v540_v37 = vld [vmem:[#allocation4 + $0x68] sm:$0xff] }
  0x5a   : > { %v780_v22 = vpack.c.bf16 %v538_v21, %v537_v20  ;;  %v314_v28 = vrot.slane %v309_v26, %v313_v25  ;;  %v318_v29 = vrot.slane %v309_v26, %v317_v27  ;;  %v539_v36 = vld [vmem:[#allocation4 + $0x60] sm:$0xff]  ;;  %v545_v45 = vld [vmem:[#allocation4 + $0x90] sm:$0xff] }
  0x5b   : > { %v783_v38 = vpack.c.bf16 %v540_v37, %v539_v36  ;;  %v543_v42 = vld [vmem:[#allocation4 + $0x80] sm:$0xff] }
  0x5c   : > { %743 = vmatpush1.bf16.msra.mxu1 %v742_v39  ;;  %769 = vmatpush1.bf16.msra.mxu0 %v768_v10  ;;  %v541_v39 = vld [vmem:[#allocation4 + $0x70] sm:$0xff]  ;;  %v438_v48 = vld [vmem:[%s1094_s4] sm:$0x3] }
  0x5d   : > { %745 = vmatprep.subr.bf16.mxu1 %v744_v40  ;;  %770 = vmatprep.subr.bf16.mxu0 %v916_v7  ;;  %v542_v40 = vld [vmem:[#allocation4 + $0x78] sm:$0xff]  ;;  %v447_v50 = vrot.slane %v438_v48, %v317_v27  ;;  %v716_v57 = vld [vmem:[%s1096_s6] ss:$0 sm:$0xff] }
  0x5e   : > { %v786_v41 = vpack.c.bf16 %v542_v40, %v541_v39 }
  0x60   : > { %747 = vmatpush1.bf16.msra.mxu1 %v746_v43  ;;  %772 = vmatpush1.bf16.msra.mxu0 %v771_v13  ;;  %v544_v43 = vld [vmem:[#allocation4 + $0x88] sm:$0xff] }
  0x61   : > { %749 = vmatprep.subr.bf16.mxu1 %v748_v46  ;;  %773 = vmatprep.subr.bf16.mxu0 %v916_v7  ;;  %v789_v44 = vpack.c.bf16 %v544_v43, %v543_v42  ;;  %v546_v46 = vld [vmem:[#allocation4 + $0x98] sm:$0xff] }
  0x62   : > { %v792_v47 = vpack.c.bf16 %v546_v46, %v545_v45 }
  0x64   : > { %751 = vmatpush1.bf16.msra.mxu1 %v750_v49  ;;  %775 = vmatpush1.bf16.msra.mxu0 %v774_v16  ;;  %v443_v49 = vrot.slane %v438_v48, %v313_v25 }
  0x65   : > { %753 = vmatprep.subr.bf16.mxu1 %v752_v52  ;;  %776 = vmatprep.subr.bf16.mxu0 %v916_v7 }
  0x68   : > { %755 = vmatpush1.bf16.msra.mxu1 %v754_v55  ;;  %778 = vmatpush1.bf16.msra.mxu0 %v777_v19 }
  0x69   : > { %757 = vmatprep.subr.bf16.mxu1 %v756_v59  ;;  %779 = vmatprep.subr.bf16.mxu0 %v916_v7 }
  0x6c   : > { %759 = vmatpush1.bf16.msra.mxu1 %v758_v63  ;;  %781 = vmatpush1.bf16.msra.mxu0 %v780_v22 }
  0x6d   : > { %761 = vmatprep.subr.bf16.mxu1 %v760_v0  ;;  %782 = vmatprep.subr.bf16.mxu0 %v916_v7 }
  0x70   : > { %763 = vmatpush1.bf16.msra.mxu1 %v762_v3  ;;  %784 = vmatpush1.bf16.msra.mxu0 %v783_v38 }
  0x71   : > { %785 = vmatprep.subr.bf16.mxu0 %v916_v7 }
  0x74   : > { %787 = vmatpush1.bf16.msra.mxu0 %v786_v41 }
  0x75   : > { %788 = vmatprep.subr.bf16.mxu0 %v916_v7 }
  0x78   : > { %790 = vmatpush1.bf16.msra.mxu0 %v789_v44 }
  0x79   : > { %791 = vmatprep.subr.bf16.mxu0 %v916_v7 }
  0x7c   : > { %793 = vmatpush1.bf16.msra.mxu0 %v792_v47 }
 0x120   : > { %v391_v30 = vpop.f32.mrb[0].mxu0 }
 0x121   : > { %v392_v31 = vadd.f32 %v391_v30, %v314_v28  ;;  %v393_v32 = vpop.f32.mrb[1].mxu0 }
 0x122   : > { %v394_v33 = vadd.f32 %v393_v32, %v318_v29 }
 0x124   : > { %829 = vtanh.f32 %v394_v33 }
 0x125   : > { %831 = vtanh.f32 %v392_v31 }
 0x12e   : > { %v830_v34 = vpop.eup %829 }
 0x12f   : > { %v832_v35 = vpop.eup %831  ;;  %715 = vmatprep.mubr.msk.f32.mxu1 %vm450_vm1, %v830_v34 }
 0x130   : > { %519 = vmatmul.mubr.f32.vlgmr.msra.gmra.mrb[0].mxu1 %v832_v35 }
 0x203   : > { %v520_v51 = vpop.f32.mrb[0].mxu1 }
 0x204   : > { %v521_v52 = vadd.f32 %v520_v51, %v443_v49  ;;  %v522_v53 = vpop.f32.mrb[1].mxu1 }
 0x205   : > { %v523_v54 = vadd.f32 %v522_v53, %v447_v50 }
 0x207   : > { %833 = vtanh.f32 %v523_v54 }
 0x208   : > { %835 = vtanh.f32 %v521_v52 }
 0x211   : > { %v834_v55 = vpop.eup %833 }
 0x212   : > { %v836_v56 = vpop.eup %835  ;;  %717 = vmatprep.mubr.msk.f32.mxu0 %vm450_vm1, %v834_v55 }
 0x213   : > { %622 = vmatmul.mubr.f32.vlgmr.msra.gmra.mrb[2].mxu0 %v836_v56 }
 0x2e6   : > { %v623_v58 = vpop.f32.mrb[2].mxu0 }
 0x2e7   : > { %v624_v59 = vadd.f32 %v716_v57, %v623_v58  ;;  %v625_v60 = vpop.f32.mrb[3].mxu0 }
 0x2e9   : > { %627 = vst [vmem:[%s303_s14] sm:$0xff] %v624_v59 }
 0x2ea PF: > { %s19_s24 = sadd.s32 1, %s907_s24  }
 0x2eb   : > { %p16_p5 = scmp.ge.s32.totalorder %s19_s24, 4  }
 0x2ed   :  { %18 = sbr.rel (!%p16_p5) target bundleno = 2 (0x2), region = 87 }
 0x2f4   :  { %647 = vsyncpa [#allocation3], 1 }
 0x2f5   :  { %649 = vsyncpa [#allocation3 + $0x1], 1 }
 0x2f6   :  { %650 = vsyncpa [#allocation5], 1 }

</bundles_post_ra>
